<compile_context>
chip_gen: v7x
topology: tpu7x:2x2x1
jax: 0.10.0
libtpu: 0.0.40
codegen_flags: <defaults>
</compile_context>

<pallas_src>
import math
import functools

import numpy as np
import jax
import jax.numpy as jnp
from jax.experimental import pallas as pl
from jax.experimental.pallas import tpu as pltpu

_LANES = 128
_DEG2RAD = math.pi / 180.0


# ------------------------ symbolic 4x4 helpers (traced) --------------------- #
# Matrix = row-major list of 16 entries; an entry is a Python float constant
# (0.0 / 1.0), a 0-d scalar (from SMEM), or a (1, N) lane-dense array.  Float
# constants are simplified away so the sparse similarity matrices cost only
# the non-trivial multiplies.

def _mul(a, b):
    if isinstance(a, float):
        if a == 0.0:
            return 0.0
        if a == 1.0:
            return b
    if isinstance(b, float):
        if b == 0.0:
            return 0.0
        if b == 1.0:
            return a
    return a * b


def _add(a, b):
    if isinstance(a, float) and a == 0.0:
        return b
    if isinstance(b, float) and b == 0.0:
        return a
    return a + b


def _mm4(a, b):
    """c = a @ b for symbolic 4x4 matrices (vectorised over lanes)."""
    c = [0.0] * 16
    for i in range(4):
        for k in range(4):
            acc = 0.0
            for j in range(4):
                acc = _add(acc, _mul(a[4 * i + j], b[4 * j + k]))
            c[4 * i + k] = acc
    return c


# ------------------------------- Pallas kernel ------------------------------ #

def _rigid_kernel(par_ref, cr_ref, prod_ref):
    n = prod_ref.shape[1]
    f32 = jnp.float32

    # Per-item raw parameters, lane-dense (1, n) rows.
    ax = par_ref[0:1, :] * _DEG2RAD
    ay = par_ref[1:2, :] * _DEG2RAD
    az = par_ref[2:3, :] * _DEG2RAD
    tx = par_ref[3:4, :]
    ty = par_ref[4:5, :]
    tz = par_ref[5:6, :]
    sxy = jnp.exp(par_ref[6:7, :] * 0.01)
    sz = jnp.exp(par_ref[7:8, :] * 0.01)

    cax, sax = jnp.cos(ax), jnp.sin(ax)
    cay, say = jnp.cos(ay), jnp.sin(ay)
    caz, saz = jnp.cos(az), jnp.sin(az)

    cr0, cr1, cr2 = cr_ref[0], cr_ref[1], cr_ref[2]

    # T1..T7 exactly as in compute_affine_matrix / compute_params.
    T1 = [1.0, 0.0, 0.0, -cr0,
          0.0, 1.0, 0.0, -cr1,
          0.0, 0.0, 1.0, -cr2,
          0.0, 0.0, 0.0, 1.0]
    T2 = [sxy, 0.0, 0.0, 0.0,
          0.0, sxy, 0.0, 0.0,
          0.0, 0.0, sz, 0.0,
          0.0, 0.0, 0.0, 1.0]
    T3 = [1.0, 0.0, 0.0, 0.0,
          0.0, cax, -sax, 0.0,
          0.0, sax, cax, 0.0,
          0.0, 0.0, 0.0, 1.0]
    T4 = [cay, 0.0, say, 0.0,
          0.0, 1.0, 0.0, 0.0,
          -say, 0.0, cay, 0.0,
          0.0, 0.0, 0.0, 1.0]
    T5 = [caz, -saz, 0.0, 0.0,
          saz, caz, 0.0, 0.0,
          0.0, 0.0, 1.0, 0.0,
          0.0, 0.0, 0.0, 1.0]
    T6 = [1.0, 0.0, 0.0, cr0,
          0.0, 1.0, 0.0, cr1,
          0.0, 0.0, 1.0, cr2,
          0.0, 0.0, 0.0, 1.0]
    T7 = [1.0, 0.0, 0.0, tx,
          0.0, 1.0, 0.0, ty,
          0.0, 0.0, 1.0, tz,
          0.0, 0.0, 0.0, 1.0]

    # Balanced-tree chain: ((T7 T6)(T5 T4)) @ ((T3 T2) T1).
    A = _mm4(T7, T6)
    B = _mm4(T5, T4)
    C = _mm4(T3, T2)
    P = _mm4(_mm4(A, B), _mm4(C, T1))

    def bcast(e):
        if isinstance(e, float):
            return jnp.full((1, n), e, dtype=f32)
        return jnp.broadcast_to(e, (1, n)).astype(f32)

    # Single full-tile lane-dense store.
    prod_ref[...] = jnp.concatenate([bcast(e) for e in P], axis=0)


def _rigid_similarity_pallas(par, cr):
    n_pad = par.shape[1]
    n_blocks = n_pad // _LANES
    # TODO(synk): for very large num_slices (>= ~1k), pack items onto
    # sublanes as well as lanes ((8,128) tile per matrix element) to lift
    # VALU lane utilisation from 12.5% to full.
    return pl.pallas_call(
        _rigid_kernel,
        out_shape=jax.ShapeDtypeStruct((16, n_pad), jnp.float32),
        grid=(n_blocks,),
        in_specs=[
            pl.BlockSpec((8, _LANES), lambda i: (0, i)),
            pl.BlockSpec(memory_space=pltpu.MemorySpace.SMEM),
        ],
        out_specs=pl.BlockSpec((16, _LANES), lambda i: (0, i)),
        compiler_params=pltpu.CompilerParams(
            dimension_semantics=("parallel",)),
    )(par, cr)


# ----------------------------------- forward -------------------------------- #

@functools.partial(jax.jit, static_argnames=("num_slices",))
def forward(params, header, vol_affine, cr, *, num_slices):
    """Returns (affine, new_header, total_affine) like the PyTorch module."""
    S = num_slices
    N = S + 1                                    # S per-slice items + 1 global item
    NP = ((N + _LANES - 1) // _LANES) * _LANES   # lane-pad

    sl_ang = params["slice_angle"][:, :, 0].astype(jnp.float32)   # (S, 3)
    g_ang = params["angle"][:, 0].astype(jnp.float32)             # (3,)
    g_tra = params["translation"][:, 0].astype(jnp.float32)       # (3,)
    sl_sca = params["slice_scaling"][:, 0].astype(jnp.float32)    # (S,)
    g_sca = params["scaling"][:, 0].astype(jnp.float32)           # (2,)

    ang = jnp.concatenate([sl_ang, g_ang[None]], axis=0)          # (N, 3)
    # Reference bug reproduced: slice_angle doubles as per-slice translation.
    tra = jnp.concatenate([sl_ang, g_tra[None]], axis=0)          # (N, 3)
    sxy = jnp.concatenate([sl_sca, g_sca[0:1]], axis=0)           # (N,)
    szv = jnp.concatenate([jnp.zeros((S,), jnp.float32), g_sca[1:2]], axis=0)

    # Fused packing: one concatenate + one pad (items on lanes).
    par = jnp.concatenate([ang.T, tra.T, sxy[None], szv[None]], axis=0)  # (8, N)
    par = jnp.pad(par, ((0, 0), (0, NP - N)))

    prod = _rigid_similarity_pallas(par, cr.astype(jnp.float32))  # (16, NP)

    total_affine = prod[:12, :S].T.reshape(S, 3, 4)               # per-slice T[:3]
    T_global = prod[:, S].reshape(4, 4)
    new_header = T_global @ header.astype(jnp.float32)
    affine = (jnp.linalg.inv(new_header)
              @ vol_affine.astype(jnp.float32))[:3][None]         # (1, 3, 4)
    return affine, new_header, total_affine


# --------------------------- pure-JAX reference ----------------------------- #

def _build_global_matrices(translation, angle, scaling, cr):
    eye = jnp.eye(4, dtype=jnp.float32)
    angr = angle[:, 0] / 180.0 * math.pi
    sxy = jnp.exp(scaling[0, 0] / 100.0)
    sz = jnp.exp(scaling[1, 0] / 100.0)
    ca, sa = jnp.cos(angr), jnp.sin(angr)
    T1 = eye.at[0, 3].set(-cr[0]).at[1, 3].set(-cr[1]).at[2, 3].set(-cr[2])
    T2 = eye.at[0, 0].set(sxy).at[1, 1].set(sxy).at[2, 2].set(sz)
    T3 = (eye.at[1, 1].set(ca[0]).at[1, 2].set(-sa[0])
             .at[2, 1].set(sa[0]).at[2, 2].set(ca[0]))
    T4 = (eye.at[0, 0].set(ca[1]).at[0, 2].set(sa[1])
             .at[2, 0].set(-sa[1]).at[2, 2].set(ca[1]))
    T5 = (eye.at[0, 0].set(ca[2]).at[0, 1].set(-sa[2])
             .at[1, 0].set(sa[2]).at[1, 1].set(ca[2]))
    T6 = eye.at[0, 3].set(cr[0]).at[1, 3].set(cr[1]).at[2, 3].set(cr[2])
    T7 = (eye.at[0, 3].set(translation[0, 0])
             .at[1, 3].set(translation[1, 0])
             .at[2, 3].set(translation[2, 0]))
    return [T7, T6, T5, T4, T3, T2, T1]


def _build_slice_matrices(slice_angle, slice_scaling, cr):
    S = slice_angle.shape[0]
    angr = slice_angle[:, :, 0] / 180.0 * math.pi
    sxy = jnp.exp(slice_scaling[:, 0] / 100.0)
    ca, sa = jnp.cos(angr), jnp.sin(angr)
    eye = jnp.broadcast_to(jnp.eye(4, dtype=jnp.float32), (S, 4, 4))
    T1 = eye.at[:, 0, 3].set(-cr[0]).at[:, 1, 3].set(-cr[1]).at[:, 2, 3].set(-cr[2])
    T2 = eye.at[:, 0, 0].set(sxy).at[:, 1, 1].set(sxy)
    T3 = (eye.at[:, 1, 1].set(ca[:, 0]).at[:, 1, 2].set(-sa[:, 0])
             .at[:, 2, 1].set(sa[:, 0]).at[:, 2, 2].set(ca[:, 0]))
    T4 = (eye.at[:, 0, 0].set(ca[:, 1]).at[:, 0, 2].set(sa[:, 1])
             .at[:, 2, 0].set(-sa[:, 1]).at[:, 2, 2].set(ca[:, 1]))
    T5 = (eye.at[:, 0, 0].set(ca[:, 2]).at[:, 0, 1].set(-sa[:, 2])
             .at[:, 1, 0].set(sa[:, 2]).at[:, 1, 1].set(ca[:, 2]))
    T6 = eye.at[:, 0, 3].set(cr[0]).at[:, 1, 3].set(cr[1]).at[:, 2, 3].set(cr[2])
    trans = slice_angle[:, :, 0]
    T7 = (eye.at[:, 0, 3].set(trans[:, 0])
             .at[:, 1, 3].set(trans[:, 1])
             .at[:, 2, 3].set(trans[:, 2]))
    return [T7, T6, T5, T4, T3, T2, T1]


def _ref_forward(params, header, vol_affine, cr, num_slices):
    g_mats = _build_global_matrices(params["translation"], params["angle"],
                                    params["scaling"], cr)
    T = g_mats[0]
    for m in g_mats[1:]:
        T = T @ m
    new_header = T @ header
    aff = jnp.linalg.inv(new_header) @ vol_affine
    affine = aff[:3][None]

    s_mats = _build_slice_matrices(params["slice_angle"],
                                   params["slice_scaling"], cr)
    Ts = s_mats[0]
    for m in s_mats[1:]:
        Ts = jnp.einsum('sij,sjk->sik', Ts, m)
    total_affine = Ts[:, :3, :]
    return affine, new_header, total_affine


# ------------------------------------ main ----------------------------------- #

if __name__ == "__main__":
    key = jax.random.PRNGKey(0)
    vol_shape = (16, 16, 16)             # ndims = 3
    block_shape = (16, 16, 8)            # block_shape[:2] spatial, [-1] = num_slices
    num_slices = block_shape[-1]

    k = jax.random.split(key, 8)
    params = {
        "translation": 0.5 * jax.random.normal(k[0], (3, 1), jnp.float32),
        "angle": 5.0 * jax.random.normal(k[1], (3, 1), jnp.float32),
        "scaling": 2.0 * jax.random.normal(k[2], (2, 1), jnp.float32),
        "slice_scaling": 2.0 * jax.random.normal(k[3], (num_slices, 1), jnp.float32),
        "slice_translation": 0.5 * jax.random.normal(k[4], (num_slices, 3, 1), jnp.float32),
        "slice_angle": 5.0 * jax.random.normal(k[5], (num_slices, 3, 1), jnp.float32),
    }

    crs = jnp.stack([jnp.array([7.5, 7.5, 3.5], jnp.float32),
                     jnp.array([8.5, 6.5, 4.5], jnp.float32)])
    cr = jnp.mean(crs, axis=0)

    vol_affine = jnp.eye(4, dtype=jnp.float32).at[:3, 3].set(
        jnp.array([1.0, -2.0, 0.5], jnp.float32))
    header = jnp.eye(4, dtype=jnp.float32) + 0.01 * jax.random.normal(
        k[6], (4, 4), jnp.float32)

    affine, new_header, total_affine = forward(params, header, vol_affine, cr,
                                               num_slices=num_slices)
    jax.block_until_ready((affine, new_header, total_affine))

    ra, rh, rt = _ref_forward(params, header, vol_affine, cr, num_slices)
    np.testing.assert_allclose(np.asarray(new_header), np.asarray(rh),
                               rtol=1e-4, atol=1e-4)
    np.testing.assert_allclose(np.asarray(total_affine), np.asarray(rt),
                               rtol=1e-4, atol=1e-4)
    np.testing.assert_allclose(np.asarray(affine), np.asarray(ra),
                               rtol=1e-4, atol=1e-4)

    assert affine.shape == (1, 3, 4)
    assert new_header.shape == (4, 4)
    assert total_affine.shape == (num_slices, 3, 4)
    print("KERNEL_OK")
</pallas_src>

<mosaic_0001>
module attributes {stable_mosaic.version = 11 : i64} {
  func.func @_rigid_kernel(%arg0: i32, %arg1: memref<8x128xf32, #tpu.memory_space<vmem>>, %arg2: memref<3xf32, #tpu.memory_space<smem>>, %arg3: memref<16x128xf32, #tpu.memory_space<vmem>>) attributes {dimension_semantics = [#tpu.dimension_semantics<parallel>], iteration_bounds = array<i64: 1>, scalar_prefetch = 0 : i64, scratch_operands = 0 : i64, tpu.core_type = #tpu.core_type<tc>, window_params = [{transform_indices = @transform_0, window_bounds = array<i64: 8, 128>}, {transform_indices = @transform_1, window_bounds = array<i64: 3>}, {transform_indices = @transform_2, window_bounds = array<i64: 16, 128>}]} {
    %c0 = arith.constant 0 : index
    %c0_0 = arith.constant 0 : index
    %0 = vector.load %arg1[%c0, %c0_0] : memref<8x128xf32, #tpu.memory_space<vmem>>, vector<1x128xf32>
    %cst = arith.constant 0.0174532924 : f32
    %1 = vector.broadcast %cst : f32 to vector<1x128xf32>
    %2 = arith.mulf %0, %1 : vector<1x128xf32>
    %c1 = arith.constant 1 : index
    %c0_1 = arith.constant 0 : index
    %3 = vector.load %arg1[%c1, %c0_1] : memref<8x128xf32, #tpu.memory_space<vmem>>, vector<1x128xf32>
    %cst_2 = arith.constant 0.0174532924 : f32
    %4 = vector.broadcast %cst_2 : f32 to vector<1x128xf32>
    %5 = arith.mulf %3, %4 : vector<1x128xf32>
    %c2 = arith.constant 2 : index
    %c0_3 = arith.constant 0 : index
    %6 = vector.load %arg1[%c2, %c0_3] : memref<8x128xf32, #tpu.memory_space<vmem>>, vector<1x128xf32>
    %cst_4 = arith.constant 0.0174532924 : f32
    %7 = vector.broadcast %cst_4 : f32 to vector<1x128xf32>
    %8 = arith.mulf %6, %7 : vector<1x128xf32>
    %c3 = arith.constant 3 : index
    %c0_5 = arith.constant 0 : index
    %9 = vector.load %arg1[%c3, %c0_5] : memref<8x128xf32, #tpu.memory_space<vmem>>, vector<1x128xf32>
    %c4 = arith.constant 4 : index
    %c0_6 = arith.constant 0 : index
    %10 = vector.load %arg1[%c4, %c0_6] : memref<8x128xf32, #tpu.memory_space<vmem>>, vector<1x128xf32>
    %c5 = arith.constant 5 : index
    %c0_7 = arith.constant 0 : index
    %11 = vector.load %arg1[%c5, %c0_7] : memref<8x128xf32, #tpu.memory_space<vmem>>, vector<1x128xf32>
    %c6 = arith.constant 6 : index
    %c0_8 = arith.constant 0 : index
    %12 = vector.load %arg1[%c6, %c0_8] : memref<8x128xf32, #tpu.memory_space<vmem>>, vector<1x128xf32>
    %cst_9 = arith.constant 0.00999999977 : f32
    %13 = vector.broadcast %cst_9 : f32 to vector<1x128xf32>
    %14 = arith.mulf %12, %13 : vector<1x128xf32>
    %15 = math.exp %14 : vector<1x128xf32>
    %c7 = arith.constant 7 : index
    %c0_10 = arith.constant 0 : index
    %16 = vector.load %arg1[%c7, %c0_10] : memref<8x128xf32, #tpu.memory_space<vmem>>, vector<1x128xf32>
    %cst_11 = arith.constant 0.00999999977 : f32
    %17 = vector.broadcast %cst_11 : f32 to vector<1x128xf32>
    %18 = arith.mulf %16, %17 : vector<1x128xf32>
    %19 = math.exp %18 : vector<1x128xf32>
    %20 = math.cos %2 : vector<1x128xf32>
    %21 = math.sin %2 : vector<1x128xf32>
    %22 = math.cos %5 : vector<1x128xf32>
    %23 = math.sin %5 : vector<1x128xf32>
    %24 = math.cos %8 : vector<1x128xf32>
    %25 = math.sin %8 : vector<1x128xf32>
    %c0_12 = arith.constant 0 : index
    %26 = memref.load %arg2[%c0_12] : memref<3xf32, #tpu.memory_space<smem>>
    %c1_13 = arith.constant 1 : index
    %27 = memref.load %arg2[%c1_13] : memref<3xf32, #tpu.memory_space<smem>>
    %c2_14 = arith.constant 2 : index
    %28 = memref.load %arg2[%c2_14] : memref<3xf32, #tpu.memory_space<smem>>
    %cst_15 = arith.constant 0.000000e+00 : f32
    %29 = arith.subf %cst_15, %26 : f32
    %cst_16 = arith.constant 0.000000e+00 : f32
    %30 = arith.subf %cst_16, %27 : f32
    %cst_17 = arith.constant 0.000000e+00 : f32
    %31 = arith.subf %cst_17, %28 : f32
    %cst_18 = arith.constant 0.000000e+00 : f32
    %32 = vector.broadcast %cst_18 : f32 to vector<1x128xf32>
    %33 = arith.subf %32, %21 : vector<1x128xf32>
    %cst_19 = arith.constant 0.000000e+00 : f32
    %34 = vector.broadcast %cst_19 : f32 to vector<1x128xf32>
    %35 = arith.subf %34, %23 : vector<1x128xf32>
    %cst_20 = arith.constant 0.000000e+00 : f32
    %36 = vector.broadcast %cst_20 : f32 to vector<1x128xf32>
    %37 = arith.subf %36, %25 : vector<1x128xf32>
    %38 = vector.broadcast %26 : f32 to vector<1x128xf32>
    %39 = arith.addf %38, %9 : vector<1x128xf32>
    %40 = vector.broadcast %27 : f32 to vector<1x128xf32>
    %41 = arith.addf %40, %10 : vector<1x128xf32>
    %42 = vector.broadcast %28 : f32 to vector<1x128xf32>
    %43 = arith.addf %42, %11 : vector<1x128xf32>
    %44 = arith.mulf %24, %22 : vector<1x128xf32>
    %45 = arith.mulf %24, %23 : vector<1x128xf32>
    %46 = arith.mulf %25, %22 : vector<1x128xf32>
    %47 = arith.mulf %25, %23 : vector<1x128xf32>
    %48 = arith.mulf %20, %15 : vector<1x128xf32>
    %49 = arith.mulf %33, %19 : vector<1x128xf32>
    %50 = arith.mulf %21, %15 : vector<1x128xf32>
    %51 = arith.mulf %20, %19 : vector<1x128xf32>
    %52 = vector.broadcast %29 : f32 to vector<1x128xf32>
    %53 = arith.mulf %15, %52 : vector<1x128xf32>
    %54 = vector.broadcast %30 : f32 to vector<1x128xf32>
    %55 = arith.mulf %48, %54 : vector<1x128xf32>
    %56 = vector.broadcast %31 : f32 to vector<1x128xf32>
    %57 = arith.mulf %49, %56 : vector<1x128xf32>
    %58 = arith.addf %55, %57 : vector<1x128xf32>
    %59 = vector.broadcast %30 : f32 to vector<1x128xf32>
    %60 = arith.mulf %50, %59 : vector<1x128xf32>
    %61 = vector.broadcast %31 : f32 to vector<1x128xf32>
    %62 = arith.mulf %51, %61 : vector<1x128xf32>
    %63 = arith.addf %60, %62 : vector<1x128xf32>
    %64 = arith.mulf %44, %15 : vector<1x128xf32>
    %65 = arith.mulf %37, %48 : vector<1x128xf32>
    %66 = arith.mulf %45, %50 : vector<1x128xf32>
    %67 = arith.addf %65, %66 : vector<1x128xf32>
    %68 = arith.mulf %37, %49 : vector<1x128xf32>
    %69 = arith.mulf %45, %51 : vector<1x128xf32>
    %70 = arith.addf %68, %69 : vector<1x128xf32>
    %71 = arith.mulf %44, %53 : vector<1x128xf32>
    %72 = arith.mulf %37, %58 : vector<1x128xf32>
    %73 = arith.addf %71, %72 : vector<1x128xf32>
    %74 = arith.mulf %45, %63 : vector<1x128xf32>
    %75 = arith.addf %73, %74 : vector<1x128xf32>
    %76 = arith.addf %75, %39 : vector<1x128xf32>
    %77 = arith.mulf %46, %15 : vector<1x128xf32>
    %78 = arith.mulf %24, %48 : vector<1x128xf32>
    %79 = arith.mulf %47, %50 : vector<1x128xf32>
    %80 = arith.addf %78, %79 : vector<1x128xf32>
    %81 = arith.mulf %24, %49 : vector<1x128xf32>
    %82 = arith.mulf %47, %51 : vector<1x128xf32>
    %83 = arith.addf %81, %82 : vector<1x128xf32>
    %84 = arith.mulf %46, %53 : vector<1x128xf32>
    %85 = arith.mulf %24, %58 : vector<1x128xf32>
    %86 = arith.addf %84, %85 : vector<1x128xf32>
    %87 = arith.mulf %47, %63 : vector<1x128xf32>
    %88 = arith.addf %86, %87 : vector<1x128xf32>
    %89 = arith.addf %88, %41 : vector<1x128xf32>
    %90 = arith.mulf %35, %15 : vector<1x128xf32>
    %91 = arith.mulf %22, %50 : vector<1x128xf32>
    %92 = arith.mulf %22, %51 : vector<1x128xf32>
    %93 = arith.mulf %35, %53 : vector<1x128xf32>
    %94 = arith.mulf %22, %63 : vector<1x128xf32>
    %95 = arith.addf %93, %94 : vector<1x128xf32>
    %96 = arith.addf %95, %43 : vector<1x128xf32>
    %cst_21 = arith.constant 0.000000e+00 : f32
    %97 = vector.broadcast %cst_21 : f32 to vector<1x128xf32>
    %cst_22 = arith.constant 0.000000e+00 : f32
    %98 = vector.broadcast %cst_22 : f32 to vector<1x128xf32>
    %cst_23 = arith.constant 0.000000e+00 : f32
    %99 = vector.broadcast %cst_23 : f32 to vector<1x128xf32>
    %cst_24 = arith.constant 1.000000e+00 : f32
    %100 = vector.broadcast %cst_24 : f32 to vector<1x128xf32>
    %101 = tpu.concatenate %64, %67, %70, %76, %77, %80, %83, %89, %90, %91, %92, %96, %97, %98, %99, %100 in 0 : vector<1x128xf32>, vector<1x128xf32>, vector<1x128xf32>, vector<1x128xf32>, vector<1x128xf32>, vector<1x128xf32>, vector<1x128xf32>, vector<1x128xf32>, vector<1x128xf32>, vector<1x128xf32>, vector<1x128xf32>, vector<1x128xf32>, vector<1x128xf32>, vector<1x128xf32>, vector<1x128xf32>, vector<1x128xf32> -> vector<16x128xf32>
    %c0_25 = arith.constant 0 : index
    %c0_26 = arith.constant 0 : index
    %102 = vector.load %arg3[%c0_25, %c0_26] : memref<16x128xf32, #tpu.memory_space<vmem>>, vector<16x128xf32>
    tpu.vector_store %arg3[%c0_25, %c0_26], %101 {strides = array<i32>} : memref<16x128xf32, #tpu.memory_space<vmem>>, vector<16x128xf32>,
    return
  }
  func.func @transform_0(%arg0: i32) -> (i32, i32) {
    %c0_i32 = arith.constant 0 : i32
    %c0_i32_0 = arith.constant 0 : i32
    return %c0_i32, %arg0 : i32, i32
  }
  func.func @transform_1(%arg0: i32) -> i32 {
    %c0_i32 = arith.constant 0 : i32
    %c0_i32_0 = arith.constant 0 : i32
    return %c0_i32 : i32
  }
  func.func @transform_2(%arg0: i32) -> (i32, i32) {
    %c0_i32 = arith.constant 0 : i32
    %c0_i32_0 = arith.constant 0 : i32
    return %c0_i32, %arg0 : i32, i32
  }
}

</mosaic_0001>

<bundles_post_ra>
// kernel: squeeze.13
= control target key start
LH: loop header
LB: loop body
LE: loop exit
PB: predicated region body
PF: predicated region fallthrough
CT: control target
= control target key end

     0   :  { %s52_s8 = smov 116   ;;  %vm19_vm0 = vcmask 31744   ;;  %s53_s9 = smov 120   ;;  %v54_v10 = vmov 0.0   ;;  %s71_s0 = inlined_call_operand.vmem [shape: bf16[16], index: 0, kind: input, shape index: {}]   ;;  %s72_s1 = inlined_call_operand.vmem [shape: bf16[4,4], index: 1, kind: output, shape index: {}]  }
   0x1   :  { %v14_v0 = vld [vmem:[%s71_s0] sm:$0x1]  ;;  %s51_s0 = smov 124  }
   0x2   :  { %v15_v1 = vunpack.c.l.bf16 %v14_v0 }
   0x4   :  { %17 = vst [vmem:[#allocation1] sm:$0x3] %v15_v1 }
   0xb   :  { %v21_v2 = vld [vmem:[#allocation1] sm:$0x1]  }
   0xc   :  { %v33_v3 = vld [vmem:[#allocation1] sm:$0x1]   ;;  %22 = vrot.lane.b32.xlu0 %v21_v2, %s51_s0 }
   0xd   :  { %34 = vrot.lane.b32.xlu1 %v33_v3, %s52_s8  ;;  %v18_v4 = vld [vmem:[#allocation1] sm:$0x1]  }
   0xe   :  { %v27_v5 = vld [vmem:[#allocation1] sm:$0x1]   ;;  %20 = vst.msk [vmem:[#allocation0] sm:$0x1] %vm19_vm0, %v18_v4  }
  0x10   :  { %28 = vrot.lane.b32.xlu0 %v27_v5, %s53_s9 }
  0x7e   :  { %v23_v6 = vpop.permute.xlu0 %22  }
  0x7f   :  { %v35_v7 = vpop.permute.xlu1 %34   ;;  %26 = vst.msk [vmem:[#allocation0 + $0x1] sm:$0x1] %vm19_vm0, %v23_v6  }
  0x80   :  { %38 = vst.msk [vmem:[#allocation0 + $0x3] sm:$0x1] %vm19_vm0, %v35_v7  }
  0x82   :  { %v29_v8 = vpop.permute.xlu0 %28  }
  0x83   :  { %32 = vst.msk [vmem:[#allocation0 + $0x2] sm:$0x1] %vm19_vm0, %v29_v8  }
  0x8a   :  { %v43_v9 = vld [vmem:[#allocation0] sm:$0xf] }
  0x8b   :  { %v44_v11 = vpack.c.bf16 %v54_v10, %v43_v9 }
  0x8d   :  { %46 = vst [vmem:[%s72_s1] sm:$0x3] %v44_v11 }

// kernel: custom-call.11
= control target key start
LH: loop header
LB: loop body
LE: loop exit
PB: predicated region body
PF: predicated region fallthrough
CT: control target
= control target key end

     0   :  { %5 = vsyncpa [#allocation6], 0  ;;  %v75_v1 = vlaneseq  ;;  %v526_v2 = vmov 0   ;;  %s555_s14 = smov 0   ;;  %s605_s0 = inlined_call_operand.vmem [shape: f32[4,4], index: 0, kind: input, shape index: {}]   ;;  %s606_s1 = inlined_call_operand.vmem [shape: f32[4,4], index: 1, kind: output, shape index: {0}]   ;;  %s607_s2 = inlined_call_operand.hbm [shape: s32[4], index: 2, kind: output, shape index: {1}]   ;;  %s608_s3 = inlined_call_operand.vmem [shape: s32[4], index: 3, kind: output, shape index: {2}]  }
   0x1   :  { %v66_v0 = vld [vmem:[%s605_s0] sm:$0xf]  ;;  %74 = vst [vmem:[#allocation4] sm:$0x1] %v526_v2 }
   0x2   :  { %67 = vst [vmem:[#allocation1] sm:$0xf] %v66_v0  ;;  %v552_v3 = vshrl.u32 %v75_v1, 7 }
   0x4   :  { %79 = vst [vmem:[#allocation9] sm:$0xff] %v552_v3 }
   0x9   :  { %v70_v4 = vld [vmem:[#allocation1] sm:$0xf] }
   0xa   :  { %71 = vst [vmem:[#allocation0] sm:$0xf] %v70_v4 }
  0x11   :  { %v72_v5 = vld [vmem:[#allocation0] sm:$0xff] }
  0x12   :  { %73 = vst [vmem:[#allocation2] sm:$0xff] %v72_v5 }
  0x13 LB: > { %vm95_vm0 = vcmp.lt.s32.totalorder %v552_v3, 4  ;;  %v562_v8 = vstv %s524_s14  ;;  %s136_s0 = ssub.s32 128, %s524_s14  ;;  %v142_v38 = vand.u32 127, %v75_v1  ;;  %v145_v40 = vld [vmem:[#allocation4] ss:$0 sm:$0xff]  ;;  %s148_s15 = scalar_lea.vmem [#allocation2], %s524_s14  ;;  %s524_s14 = sphi %s555_s14, %s85_s14  }
  0x14   : > { %vm94_vm1 = vcmp.ge.s32.totalorder %v552_v3, %v562_v8  ;;  %s154_s17 = scalar_lea.vmem [#allocation9], %s524_s14  ;;  %vm174_vm15 = vcmp.gt.s32.totalorder %v552_v3, %v562_v8  ;;  %s85_s14 = sadd.s32 1, %s524_s14  }
  0x15   : > { %vm96_vm3 = vmand %vm94_vm1, %vm95_vm0  ;;  %vm166_vm12 = vcmp.gt.s32.totalorder %v142_v38, %v562_v8  ;;  %vm143_vm13 = vcmp.eq.s32.totalorder %v142_v38, %v562_v8  ;;  %v156_v42 = vld [vmem:[%s154_s17] ss:$0 sm:$0xff]  ;;  %p82_p0 = scmp.ge.s32.totalorder %s85_s14, 4  }
  0x16   : > { %vm178_vm1 = vmand %vm174_vm15, %vm143_vm13  ;;  %s527_s20 = smov (%p82_p0), [#allocation5]  }
  0x17   :  { %s319_s21 = sshll.u32 (%p82_p0), %s527_s20, 4  ;;  %s320_s21 = int_to_ptr.vmem [resolvable:$true] %s319_s21 }
  0x18   :  { %s494_s24 = scalar_lea.vmem (%p82_p0), %s320_s21, 16  ;;  %s498_s25 = scalar_lea.vmem (%p82_p0), %s320_s21, 32 }
  0x19   : > { %v90_v6 = vld [vmem:[#allocation2] sm:$0xff]  ;;  %v150_v41 = vld [vmem:[%s148_s15] ss:$0 sm:$0xff]  ;;  %p495_p1 = scmp.ne.s32.totalorder (%p82_p0), %s320_s21, %s494_s24  ;;  %p499_p2 = scmp.lt.s32.totalorder (%p82_p0), %s320_s21, %s320_s21 }
  0x1a   : > { %v91_v7 = vand.u32 2147483647, %v90_v6  ;;  %p500_p3 = scmp.lt.s32.totalorder (%p82_p0), %s498_s25, %s494_s24 }
  0x1c   : > { %vm473_vm2 = vcmp.gt.f32.partialorder %v91_v7, -inf  ;;  %p501_p4 = por (%p82_p0), %p500_p3, %p499_p2 }
  0x1d   : > { %vm98_vm4 = vmand %vm96_vm3, %vm473_vm2 }
  0x1e   : > { %v99_v9 = vsel %vm98_vm4, %v552_v3, %v562_v8  ;;  %v100_v10 = vsel %vm98_vm4, %v91_v7, -inf  ;;  %p502_p5 = pnand (%p82_p0), %p501_p4, %p495_p1 }
  0x1f   : > { %v101_v11 = vrot.slane %v100_v10, 1  ;;  %v102_v12 = vrot.slane %v99_v9, 1 }
  0x21   : > { %vm103_vm5 = vcmp.ge.f32.partialorder %v101_v11, %v100_v10  ;;  %v106_v13 = vrot.slane %v101_v11, 1  ;;  %v107_v14 = vrot.slane %v102_v12, 1 }
  0x22   : > { %v104_v15 = vsel %vm103_vm5, %v101_v11, %v100_v10  ;;  %v105_v16 = vsel %vm103_vm5, %v102_v12, %v99_v9 }
  0x23   : > { %vm108_vm6 = vcmp.ge.f32.partialorder %v106_v13, %v104_v15  ;;  %v111_v17 = vrot.slane %v106_v13, 1  ;;  %v112_v18 = vrot.slane %v107_v14, 1 }
  0x24   : > { %v109_v19 = vsel %vm108_vm6, %v106_v13, %v104_v15  ;;  %v110_v20 = vsel %vm108_vm6, %v107_v14, %v105_v16 }
  0x25   : > { %vm113_vm7 = vcmp.ge.f32.partialorder %v111_v17, %v109_v19  ;;  %v116_v21 = vrot.slane %v111_v17, 1  ;;  %v117_v22 = vrot.slane %v112_v18, 1 }
  0x26   : > { %v114_v23 = vsel %vm113_vm7, %v111_v17, %v109_v19  ;;  %v115_v24 = vsel %vm113_vm7, %v112_v18, %v110_v20 }
  0x27   : > { %vm118_vm8 = vcmp.ge.f32.partialorder %v116_v21, %v114_v23  ;;  %v121_v25 = vrot.slane %v116_v21, 1  ;;  %v122_v26 = vrot.slane %v117_v22, 1 }
  0x28   : > { %v119_v27 = vsel %vm118_vm8, %v116_v21, %v114_v23  ;;  %v120_v28 = vsel %vm118_vm8, %v117_v22, %v115_v24 }
  0x29   : > { %vm123_vm9 = vcmp.ge.f32.partialorder %v121_v25, %v119_v27  ;;  %v126_v29 = vrot.slane %v121_v25, 1  ;;  %v127_v30 = vrot.slane %v122_v26, 1 }
  0x2a   : > { %v124_v31 = vsel %vm123_vm9, %v121_v25, %v119_v27  ;;  %v125_v32 = vsel %vm123_vm9, %v122_v26, %v120_v28 }
  0x2b   : > { %vm128_vm10 = vcmp.ge.f32.partialorder %v126_v29, %v124_v31  ;;  %v131_v33 = vrot.slane %v126_v29, 1  ;;  %v132_v34 = vrot.slane %v127_v30, 1 }
  0x2c   : > { %v129_v35 = vsel %vm128_vm10, %v126_v29, %v124_v31  ;;  %v130_v36 = vsel %vm128_vm10, %v127_v30, %v125_v32 }
  0x2d   : > { %vm133_vm11 = vcmp.ge.f32.partialorder %v131_v33, %v129_v35 }
  0x2e   : > { %v135_v37 = vsel %vm133_vm11, %v132_v34, %v130_v36 }
  0x2f   : > { %137 = vrot.lane.b32.xlu0 %v135_v37, %s136_s0 }
  0xa1   : > { %v138_v39 = vpop.permute.xlu0 %137 }
  0xa2   : > { %480 = vpush %v138_v39 }
  0xd3   : > { %s481_s16 = spop %480 }
  0xd4   : > { %v144_v43 = vstv %s481_s16  ;;  %s149_s18 = scalar_lea.vmem [#allocation2], %s481_s16  ;;  %s155_s19 = scalar_lea.vmem [#allocation9], %s481_s16 }
  0xd5   : > { %v151_v44 = vld [vmem:[%s149_s18] ss:$0 sm:$0xff]  ;;  %v146_v46 = vsel %vm143_vm13, %v144_v43, %v145_v40 }
  0xd6   : > { %v157_v45 = vld [vmem:[%s155_s19] ss:$0 sm:$0xff]  ;;  %152 = vst [vmem:[%s149_s18] sm:$0x1] %v150_v41  ;;  %vm160_vm14 = vcmp.ne.f32.partialorder %v151_v44, 0.0  ;;  %147 = vst [vmem:[#allocation4] sm:$0x1] %v146_v46 }
  0xd7   : > { %158 = vst [vmem:[%s155_s19] sm:$0x1] %v156_v42  ;;  %153 = vst [vmem:[%s148_s15] sm:$0x1] %v151_v44  ;;  %v167_v53 = vsel %vm166_vm12, %v151_v44, 0.0 }
  0xd8   : > { %159 = vst [vmem:[%s154_s17] sm:$0x1] %v157_v45  ;;  %vm161_vm0 = vmand %vm143_vm13, %vm160_vm14 }
  0xd9   : > { %v162_v47 = vsel %vm161_vm0, %v151_v44, 1.0 }
  0xda   : > { %v175_v48 = vsel %vm174_vm15, %v162_v47, 1.0 }
  0xdb   : > { %492 = vrcp.f32 %v175_v48 }
  0xdd   :  { %v243_v59 = vld [vmem:[#allocation4] sm:$0x1] (%p82_p0) }
  0xde   : > { %v171_v50 = vld [vmem:[#allocation2] sm:$0xff]  ;;  %245 = vst [vmem:[#allocation5] sm:$0x1] (%p82_p0), %v243_v59 }
  0xdf   :  { %v185_v57 = vld [vmem:[#allocation9] sm:$0xff] (%p82_p0) }
  0xe5   : > { %v493_v49 = vpop.eup %492 }
  0xe6   : > { %v177_v51 = vmul.f32 %v493_v49, %v171_v50 }
  0xe8   : > { %v179_v52 = vsel %vm178_vm1, %v177_v51, 0.0 }
  0xe9   : > { %180 = vadd.xlane.f32.xlu0 %v179_v52 }
 0x116   :  { %201 = vxpose.xlu0.b32.start.end [1/1] (short) (narrow) (%p82_p0), %v185_v57, 8 }
 0x175   :  { %84 = sbr.rel (!%p82_p0) target bundleno = 19 (0x13), region = 163 }
 0x176   : > { %v181_v54 = vpop.xlane.xlu0 %180 }
 0x177   : > { %v182_v55 = vmul.f32 %v181_v54, %v167_v53 }
 0x179   : > { %v183_v56 = vsub.f32 %v177_v51, %v182_v55 }
 0x17b   : > { %184 = vst [vmem:[#allocation2] sm:$0xff] %v183_v56 }
 0x182   :  { %v237_v58 = vld [vmem:[#allocation2] sm:$0xf] }
 0x183   :  { %239 = vst [vmem:[#allocation3] sm:$0xf] %v237_v58 }
 0x18a   :  { %v312_v60 = vld [vmem:[#allocation3] sm:$0xf] }
 0x18b   :  { %313 = vst [vmem:[%s606_s1] sm:$0xf] %v312_v60 }
 0x18c   :  { %505 = shalt.err (!%p502_p5)
}
 0x18d   :  { %s506_s28 = scalar_lea.hbm %s607_s2, 16 }
 0x18e   :  { %p507_p6 = scmp.ne.s32.totalorder %s607_s2, %s506_s28  ;;  %p510_p7 = scmp.lt.u32.totalorder %s506_s28, %s607_s2 }
 0x190   :  { %p512_p8 = pnand %p510_p7, %p507_p6 }
 0x192   :  { %515 = shalt.err (!%p512_p8)
}
 0x193   :  { %322 = dma.vmem_to_hbm [thread:$0]  %s320_s21, 16, %s607_s2, [#allocation6]  }
 0x196   :  { %v217_v61 = vpop.trf.xlu0 }
 0x197   :  { %233 = vst [vmem:[#allocation7] sm:$0x1] %v217_v61 }
 0x19e   :  { %v249_v62 = vld [vmem:[#allocation7] sm:$0x1] }
 0x19f   :  { %251 = vst [vmem:[#allocation8] sm:$0x1] %v249_v62 }
 0x1a6   :  { %v385_v63 = vld [vmem:[#allocation8] sm:$0x1] }
 0x1a7   :  { %386 = vst [vmem:[%s608_s3] sm:$0x1] %v385_v63 }
 0x1a8   :  { %520 = dma.done.wait [#allocation6], 16  }
 0x1a9   :  { %521 = vsyncadd [#allocation6], 4294967280 }
 0x1aa   :  { %392 = vsyncpa [#allocation6], 1 }

// kernel: custom-call.12
= control target key start
LH: loop header
LB: loop body
LE: loop exit
PB: predicated region body
PF: predicated region fallthrough
CT: control target
= control target key end

     0   :  { %v37_v1 = vlaneseq  ;;  %v147_v11 = vmov -1.0   ;;  %s164_s0 = inlined_call_operand.vmem [shape: f32[1,4,4], index: 0, kind: input, shape index: {}]   ;;  %s165_s1 = inlined_call_operand.vmem [shape: f32[1,4,4], index: 1, kind: output, shape index: {}]  }
   0x1   :  { %v17_v0 = vld [vmem:[%s164_s0] sm:$0xf] }
   0x2   :  { %18 = vst [vmem:[#allocation1] sm:$0xf] %v17_v0  ;;  %v38_v3 = vand.u32 127, %v37_v1  ;;  %v41_v4 = vshrl.u32 %v37_v1, 7 }
   0x4   :  { %vm39_vm0 = vcmp.lt.s32.totalorder %v38_v3, 4  ;;  %vm48_vm1 = vcmp.le.s32.totalorder %v41_v4, %v38_v3  ;;  %vm43_vm2 = vcmp.eq.s32.totalorder %v41_v4, %v38_v3  ;;  %vm62_vm4 = vcmp.eq.s32.totalorder %v38_v3, 3 }
   0x5   :  { %vm49_vm3 = vmand %vm48_vm1, %vm39_vm0  ;;  %vm59_vm5 = vcmp.eq.s32.totalorder %v38_v3, %v41_v4  ;;  %v63_v12 = vsel %vm62_vm4, 1.0, %v147_v11  ;;  %vm70_vm6 = vcmp.eq.s32.totalorder %v38_v3, 2  ;;  %vm80_vm7 = vcmp.eq.s32.totalorder %v38_v3, 1 }
   0x6   :  { %v64_v13 = vsel %vm59_vm5, %v63_v12, 0.0  ;;  %vm89_vm8 = vcmp.eq.s32.totalorder %v38_v3, 0 }
   0x9   :  { %v35_v2 = vld [vmem:[#allocation1] sm:$0xf] }
   0xa   :  { %36 = vst [vmem:[#allocation0] sm:$0xf] %v35_v2 }
  0x11   :  { %v44_v5 = vld [vmem:[#allocation0] sm:$0xff] }
  0x12   :  { %v45_v6 = vsel %vm43_vm2, %v44_v5, 0.0  ;;  %v50_v7 = vsel %vm49_vm3, %v44_v5, 0.0 }
  0x13   :  { %46 = vadd.xlane.f32.xlu0 %v45_v6 }
  0xa0   :  { %v47_v8 = vpop.xlane.xlu0 %46 }
  0xa1   :  { %145 = vrcp.f32 %v47_v8  ;;  %vm96_vm9 = vweird.f32 %v47_v8 }
  0xab   :  { %v146_v9 = vpop.eup %145 }
  0xac   :  { %v52_v10 = vmul.f32 %v146_v9, %v50_v7 }
  0xae   :  { %53 = vst [vmem:[#allocation4] sm:$0xff] %v52_v10 }
  0xb5   :  { %v66_v14 = vld [vmem:[#allocation4 + $0x2] ss:$0 sm:$0xff]  ;;  %v76_v17 = vld [vmem:[#allocation4 + $0x1] ss:$0 sm:$0xff]  ;;  %v85_v22 = vld [vmem:[#allocation4] ss:$0 sm:$0xff] }
  0xb6   :  { %v67_v15 = vxor.u32 2147483648, %v66_v14  ;;  %v77_v19 = vxor.u32 2147483648, %v76_v17  ;;  %v86_v24 = vxor.u32 2147483648, %v85_v22 }
  0xb8   :  { %v71_v16 = vmul.f32 %v67_v15, %v64_v13 }
  0xba   :  { %72 = vadd.xlane.f32.xlu0 %v71_v16 }
 0x147   :  { %v73_v18 = vpop.xlane.xlu0 %72 }
 0x148   :  { %v74_v20 = vsel %vm70_vm6, %v73_v18, %v64_v13 }
 0x149   :  { %v81_v21 = vmul.f32 %v77_v19, %v74_v20 }
 0x14b   :  { %82 = vadd.xlane.f32.xlu1 %v81_v21 }
 0x1d8   :  { %v83_v23 = vpop.xlane.xlu1 %82 }
 0x1d9   :  { %v84_v25 = vsel %vm80_vm7, %v83_v23, %v74_v20 }
 0x1da   :  { %v90_v26 = vmul.f32 %v86_v24, %v84_v25 }
 0x1dc   :  { %91 = vadd.xlane.f32.xlu1 %v90_v26 }
 0x269   :  { %v92_v27 = vpop.xlane.xlu1 %91 }
 0x26a   :  { %v93_v28 = vsel %vm89_vm8, %v92_v27, %v84_v25 }
 0x26b   :  { %v95_v29 = vmul.f32 %v146_v9, %v93_v28 }
 0x26d   :  { %v97_v30 = vsel %vm96_vm9, %v93_v28, %v95_v29 }
 0x26e   :  { %98 = vst [vmem:[#allocation2] sm:$0xff] %v97_v30 }
 0x275   :  { %v102_v31 = vld [vmem:[#allocation2] sm:$0xf] }
 0x276   :  { %104 = vst [vmem:[#allocation3] sm:$0xf] %v102_v31 }
 0x27d   :  { %v120_v32 = vld [vmem:[#allocation3] sm:$0xf] }
 0x27e   :  { %121 = vst [vmem:[%s165_s1] sm:$0xf] %v120_v32 }

// kernel: custom-call.13
= control target key start
LH: loop header
LB: loop body
LE: loop exit
PB: predicated region body
PF: predicated region fallthrough
CT: control target
= control target key end

     0   :  { %v37_v1 = vlaneseq  ;;  %v148_v11 = vmov -1.0   ;;  %s165_s0 = inlined_call_operand.vmem [shape: f32[1,4,4], index: 0, kind: input, shape index: {}]   ;;  %s166_s1 = inlined_call_operand.vmem [shape: f32[1,4,4], index: 1, kind: output, shape index: {}]  }
   0x1   :  { %v17_v0 = vld [vmem:[%s165_s0] sm:$0xf] }
   0x2   :  { %18 = vst [vmem:[#allocation1] sm:$0xf] %v17_v0  ;;  %v38_v3 = vand.u32 127, %v37_v1  ;;  %v41_v4 = vshrl.u32 %v37_v1, 7 }
   0x4   :  { %vm39_vm0 = vcmp.lt.s32.totalorder %v38_v3, 4  ;;  %vm48_vm1 = vcmp.ge.s32.totalorder %v41_v4, %v38_v3  ;;  %vm43_vm2 = vcmp.eq.s32.totalorder %v41_v4, %v38_v3  ;;  %vm62_vm4 = vcmp.eq.s32.totalorder %v38_v3, 0 }
   0x5   :  { %vm49_vm3 = vmand %vm48_vm1, %vm39_vm0  ;;  %vm59_vm5 = vcmp.eq.s32.totalorder %v38_v3, %v41_v4  ;;  %v63_v12 = vsel %vm62_vm4, 1.0, %v148_v11  ;;  %vm70_vm6 = vcmp.eq.s32.totalorder %v38_v3, 1  ;;  %vm80_vm7 = vcmp.eq.s32.totalorder %v38_v3, 2 }
   0x6   :  { %v64_v13 = vsel %vm59_vm5, %v63_v12, 0.0  ;;  %vm90_vm8 = vcmp.eq.s32.totalorder %v38_v3, 3 }
   0x9   :  { %v35_v2 = vld [vmem:[#allocation1] sm:$0xf] }
   0xa   :  { %36 = vst [vmem:[#allocation0] sm:$0xf] %v35_v2 }
  0x11   :  { %v44_v5 = vld [vmem:[#allocation0] sm:$0xff] }
  0x12   :  { %v45_v6 = vsel %vm43_vm2, %v44_v5, 0.0  ;;  %v50_v7 = vsel %vm49_vm3, %v44_v5, 0.0 }
  0x13   :  { %46 = vadd.xlane.f32.xlu0 %v45_v6 }
  0xa0   :  { %v47_v8 = vpop.xlane.xlu0 %46 }
  0xa1   :  { %146 = vrcp.f32 %v47_v8  ;;  %vm97_vm9 = vweird.f32 %v47_v8 }
  0xab   :  { %v147_v9 = vpop.eup %146 }
  0xac   :  { %v52_v10 = vmul.f32 %v147_v9, %v50_v7 }
  0xae   :  { %53 = vst [vmem:[#allocation4] sm:$0xff] %v52_v10 }
  0xb5   :  { %v66_v14 = vld [vmem:[#allocation4 + $0x1] ss:$0 sm:$0xff]  ;;  %v76_v17 = vld [vmem:[#allocation4 + $0x2] ss:$0 sm:$0xff]  ;;  %v86_v22 = vld [vmem:[#allocation4 + $0x3] ss:$0 sm:$0xff] }
  0xb6   :  { %v67_v15 = vxor.u32 2147483648, %v66_v14  ;;  %v77_v19 = vxor.u32 2147483648, %v76_v17  ;;  %v87_v24 = vxor.u32 2147483648, %v86_v22 }
  0xb8   :  { %v71_v16 = vmul.f32 %v67_v15, %v64_v13 }
  0xba   :  { %72 = vadd.xlane.f32.xlu0 %v71_v16 }
 0x147   :  { %v73_v18 = vpop.xlane.xlu0 %72 }
 0x148   :  { %v74_v20 = vsel %vm70_vm6, %v73_v18, %v64_v13 }
 0x149   :  { %v81_v21 = vmul.f32 %v77_v19, %v74_v20 }
 0x14b   :  { %82 = vadd.xlane.f32.xlu1 %v81_v21 }
 0x1d8   :  { %v83_v23 = vpop.xlane.xlu1 %82 }
 0x1d9   :  { %v84_v25 = vsel %vm80_vm7, %v83_v23, %v74_v20 }
 0x1da   :  { %v91_v26 = vmul.f32 %v87_v24, %v84_v25 }
 0x1dc   :  { %92 = vadd.xlane.f32.xlu1 %v91_v26 }
 0x269   :  { %v93_v27 = vpop.xlane.xlu1 %92 }
 0x26a   :  { %v94_v28 = vsel %vm90_vm8, %v93_v27, %v84_v25 }
 0x26b   :  { %v96_v29 = vmul.f32 %v147_v9, %v94_v28 }
 0x26d   :  { %v98_v30 = vsel %vm97_vm9, %v94_v28, %v96_v29 }
 0x26e   :  { %99 = vst [vmem:[#allocation2] sm:$0xff] %v98_v30 }
 0x275   :  { %v103_v31 = vld [vmem:[#allocation2] sm:$0xf] }
 0x276   :  { %105 = vst [vmem:[#allocation3] sm:$0xf] %v103_v31 }
 0x27d   :  { %v121_v32 = vld [vmem:[#allocation3] sm:$0xf] }
 0x27e   :  { %122 = vst [vmem:[%s166_s1] sm:$0xf] %v121_v32 }

// kernel: forward.1
= control target key start
LH: loop header
LB: loop body
LE: loop exit
PB: predicated region body
PF: predicated region fallthrough
CT: control target
= control target key end

     0   :  { %7 = vsyncpa [#allocation3], 0  ;;  %s1180_s0 = inlined_call_operand.vmem [shape: f32[8,128], index: 0, kind: input, shape index: {}]   ;;  %s1181_s1 = inlined_call_operand.vmem [shape: f32[3], index: 1, kind: input, shape index: {}]   ;;  %s1182_s2 = inlined_call_operand.vmem [shape: f32[16,128], index: 2, kind: output, shape index: {}]  }
   0x1   :  { %s16_s11 = sshll.u32 %s1181_s1, 4  ;;  %s17_s11 = int_to_ptr.vmem [resolvable:$true] %s16_s11 }
   0x2   :  { %s847_s12 = scalar_lea.vmem %s17_s11, 16  ;;  %p852_p1 = scmp.lt.s32.totalorder %s17_s11, %s17_s11 }
   0x3   :  { %p848_p0 = scmp.ne.s32.totalorder %s17_s11, %s847_s12  ;;  %p853_p2 = scmp.lt.s32.totalorder %s847_s12, %s847_s12 }
   0x5   :  { %p854_p3 = por %p853_p2, %p852_p1 }
   0x7   :  { %p855_p4 = pnand %p854_p3, %p848_p0 }
   0x9   :  { %858 = shalt.err (!%p855_p4)
}
   0xa   :  { %s861_s13 = smov [#allocation2]  }
   0xb   :  { %19 = dma.vmem_to_smem %s17_s11, 16, %s861_s13, [#allocation3]  }
   0xc   :  { %859 = dma.done.wait [#allocation3], 16  }
   0xd   :  { %860 = vsyncadd [#allocation3], 4294967280 }
   0xe   :  { %23 = sfence }
   0xf   :  { %v24_v0 = vld [vmem:[%s1180_s0] sm:$0x1]  ;;  %v26_v1 = vld [vmem:[%s1180_s0 + $0x1] sm:$0x1]  ;;  %v28_v5 = vld [vmem:[%s1180_s0 + $0x2] sm:$0x1] }
  0x10   :  { %v892_v2 = vmul.f32 0.017453292, %v24_v0  ;;  %v894_v3 = vmul.f32 0.017453292, %v26_v1  ;;  %v901_v8 = vmul.f32 0.017453292, %v28_v5 }
  0x11   :  { %v862_v28 = vmov 683565275   ;;  %v863_v30 = vmov 2475754826   ;;  %v864_v32 = vmov 2131351028  }
  0x12   :  { %v41_v4 = vand.u32 2147483647, %v892_v2  ;;  %v44_v6 = vand.u32 2139095040, %v892_v2  ;;  %v251_v10 = vand.u32 2139095040, %v894_v3  ;;  %v248_v12 = vand.u32 2147483647, %v894_v3 }
  0x13   :  { %v458_v17 = vand.u32 2139095040, %v901_v8  ;;  %v865_v34 = vmov 2102212464   ;;  %v866_v36 = vmov 920167782   ;;  %s1050_s23 = sld [smem:[#allocation2 + $0x1]] }
  0x14   :  { %v45_v7 = vshrl.u32 %v44_v6, 23  ;;  %v48_v9 = vand.u32 8388607, %v41_v4  ;;  %v252_v14 = vshrl.u32 %v251_v10, 23  ;;  %v255_v16 = vand.u32 8388607, %v248_v12 }
  0x15   :  { %v459_v21 = vshrl.u32 %v458_v17, 23  ;;  %v867_v44 = vmov 1326507024   ;;  %s1056_s24 = sld [smem:[#allocation2 + $0x2]]  ;;  %s1061_s25 = sld [smem:[#allocation2]] }
  0x16   :  { %v786_v11 = vadd.s32 4294967169, %v45_v7  ;;  %v49_v15 = vor.u32 8388608, %v48_v9  ;;  %v794_v18 = vadd.s32 4294967169, %v252_v14  ;;  %v256_v20 = vor.u32 8388608, %v255_v16 }
  0x17   :  { %v802_v38 = vadd.s32 4294967169, %v459_v21 }
  0x18   :  { %v51_v13 = vadd.s32 1, %v786_v11  ;;  %v910_v24 = vshll.u32 %v49_v15, 8  ;;  %v258_v25 = vadd.s32 1, %v794_v18  ;;  %v912_v26 = vshll.u32 %v256_v20, 8 }
  0x19   :  { %v465_v6 = vadd.s32 1, %v802_v38  ;;  %s666_s26 = ssub.f32 0.0, %s1050_s23 }
  0x1a   :  { %vm52_vm0 = vcmp.gt.s32.totalorder %v51_v13, 0  ;;  %vm259_vm4 = vcmp.gt.s32.totalorder %v258_v25, 0 }
  0x1b   :  { %v53_v19 = vsel %vm52_vm0, %v51_v13, 0  ;;  %v260_v51 = vsel %vm259_vm4, %v258_v25, 0  ;;  %vm466_vm11 = vcmp.gt.s32.totalorder %v465_v6, 0  ;;  %vm42_vm4 = vcmp.le.f32.partialorder %v41_v4, 0.7853982  ;;  %s667_s27 = ssub.f32 0.0, %s1056_s24 }
  0x1c   :  { %v54_v22 = vshrl.u32 %v53_v19, 5  ;;  %v55_v23 = vand.u32 31, %v53_v19  ;;  %v261_v59 = vshrl.u32 %v260_v51, 5  ;;  %v262_v63 = vand.u32 31, %v260_v51  ;;  %s665_s28 = ssub.f32 0.0, %s1061_s25 }
  0x1e   :  { %v56_v27 = vsub.s32 32, %v55_v23  ;;  %v58_v29 = vshll.u32 %v862_v28, %v55_v23  ;;  %v61_v31 = vshll.u32 %v863_v30, %v55_v23  ;;  %v64_v33 = vshll.u32 %v864_v32, %v55_v23 }
  0x1f   :  { %v67_v35 = vshll.u32 %v865_v34, %v55_v23  ;;  %v70_v37 = vshll.u32 %v866_v36, %v55_v23  ;;  %vm73_vm1 = vcmp.lt.s32.totalorder %v54_v22, 1  ;;  %vm74_vm2 = vcmp.lt.s32.totalorder %v54_v22, 2 }
  0x20   :  { %v57_v39 = vshrl.u32 %v862_v28, %v56_v27  ;;  %v59_v40 = vshrl.u32 %v863_v30, %v56_v27  ;;  %v62_v41 = vshrl.u32 %v864_v32, %v56_v27  ;;  %v65_v42 = vshrl.u32 %v865_v34, %v56_v27 }
  0x21   :  { %v68_v43 = vshrl.u32 %v866_v36, %v56_v27  ;;  %v71_v45 = vshrl.u32 %v867_v44, %v56_v27  ;;  %vm76_vm3 = vcmp.lt.s32.totalorder %v54_v22, 4  ;;  %vm75_vm5 = vcmp.lt.s32.totalorder %v54_v22, 3 }
  0x22   :  { %v60_v46 = vor.u32 %v59_v40, %v58_v29  ;;  %v63_v47 = vor.u32 %v62_v41, %v61_v31  ;;  %v66_v48 = vor.u32 %v65_v42, %v64_v33  ;;  %v263_v13 = vsub.s32 32, %v262_v63 }
  0x23   :  { %v69_v49 = vor.u32 %v68_v43, %v67_v35  ;;  %v72_v50 = vor.u32 %v71_v45, %v70_v37  ;;  %v265_v14 = vshll.u32 %v862_v28, %v262_v63  ;;  %v268_v15 = vshll.u32 %v863_v30, %v262_v63 }
  0x24   :  { %v77_v52 = vsel %vm73_vm1, %v57_v39, %v60_v46  ;;  %v78_v53 = vsel %vm76_vm3, %v66_v48, 2102212464  ;;  %v81_v54 = vsel %vm73_vm1, %v60_v46, %v63_v47  ;;  %v85_v55 = vsel %vm73_vm1, %v63_v47, %v66_v48 }
  0x25   :  { %v79_v56 = vsel %vm75_vm5, %v63_v47, %v78_v53  ;;  %v82_v57 = vsel %vm76_vm3, %v69_v49, 920167782  ;;  %v86_v58 = vsel %vm76_vm3, %v72_v50, 1326507024  ;;  %v271_v16 = vshll.u32 %v864_v32, %v262_v63 }
  0x26   :  { %v80_v60 = vsel %vm74_vm2, %v77_v52, %v79_v56  ;;  %v83_v61 = vsel %vm75_vm5, %v66_v48, %v82_v57  ;;  %v87_v62 = vsel %vm75_vm5, %v69_v49, %v86_v58  ;;  %v274_v17 = vshll.u32 %v865_v34, %v262_v63 }
  0x27   :  { %v84_v0 = vsel %vm74_vm2, %v81_v54, %v83_v61  ;;  %v88_v1 = vsel %vm74_vm2, %v85_v55, %v87_v62  ;;  %v96_v5 = vmul.u32 %v910_v24, %v80_v60  ;;  %v277_v18 = vshll.u32 %v866_v36, %v262_v63 }
  0x28   :  { %v933_v7 = vmul.u32.u64.low %v910_v24, %v88_v1  ;;  %v934_v9 = vmul.u32.u64.high %v910_v24, %v88_v1, %v933_v7  ;;  %v937_v10 = vmul.u32.u64.low %v910_v24, %v84_v0  ;;  %v938_v11 = vmul.u32.u64.high %v910_v24, %v84_v0, %v937_v10 }
  0x29   :  { %vm280_vm6 = vcmp.lt.s32.totalorder %v261_v59, 1  ;;  %vm281_vm7 = vcmp.lt.s32.totalorder %v261_v59, 2  ;;  %v264_v19 = vshrl.u32 %v862_v28, %v263_v13  ;;  %v266_v20 = vshrl.u32 %v863_v30, %v263_v13 }
  0x2a   :  { %v269_v21 = vshrl.u32 %v864_v32, %v263_v13  ;;  %v272_v22 = vshrl.u32 %v865_v34, %v263_v13  ;;  %vm98_vm8 = vc.u32 %v934_v9, %v937_v10  ;;  %v99_v23 = vadd.s32 1, %v938_v11 }
  0x2b   :  { %v275_v24 = vshrl.u32 %v866_v36, %v263_v13  ;;  %vm282_vm9 = vcmp.lt.s32.totalorder %v261_v59, 3  ;;  %v267_v25 = vor.u32 %v266_v20, %v265_v14  ;;  %v278_v31 = vshrl.u32 %v867_v44, %v263_v13 }
  0x2c   :  { %v270_v27 = vor.u32 %v269_v21, %v268_v15  ;;  %v273_v29 = vor.u32 %v272_v22, %v271_v16  ;;  %v100_v33 = vsel %vm98_vm8, %v99_v23, %v938_v11  ;;  %vm283_vm10 = vcmp.lt.s32.totalorder %v261_v59, 4 }
  0x2d   :  { %v276_v35 = vor.u32 %v275_v24, %v274_v17  ;;  %v101_v37 = vadd.s32 %v100_v33, %v96_v5  ;;  %v279_v38 = vor.u32 %v278_v31, %v277_v18  ;;  %v284_v39 = vsel %vm280_vm6, %v264_v19, %v267_v25 }
  0x2e   :  { %v285_v40 = vsel %vm283_vm10, %v273_v29, 2102212464  ;;  %v288_v42 = vsel %vm280_vm6, %v267_v25, %v270_v27  ;;  %v292_v45 = vsel %vm280_vm6, %v270_v27, %v273_v29  ;;  %v467_v52 = vsel %vm466_vm11, %v465_v6, 0 }
  0x2f   :  { %v286_v41 = vsel %vm282_vm9, %v270_v27, %v285_v40  ;;  %v289_v43 = vsel %vm283_vm10, %v276_v35, 920167782  ;;  %v102_v46 = vadd.s32 536870912, %v101_v37  ;;  %v293_v48 = vsel %vm283_vm10, %v279_v38, 1326507024 }
  0x30   :  { %v290_v47 = vsel %vm282_vm9, %v273_v29, %v289_v43  ;;  %v287_v49 = vsel %vm281_vm7, %v284_v39, %v286_v41  ;;  %v294_v51 = vsel %vm282_vm9, %v276_v35, %v293_v48  ;;  %v469_v61 = vand.u32 31, %v467_v52 }
  0x31   :  { %v291_v50 = vsel %vm281_vm7, %v288_v42, %v290_v47  ;;  %v964_v53 = vshrl.u32 %v102_v46, 30  ;;  %v295_v54 = vsel %vm281_vm7, %v292_v45, %v294_v51  ;;  %v303_v62 = vmul.u32 %v912_v26, %v287_v49 }
  0x32   :  { %v968_v55 = vmul.u32.u64.low %v912_v26, %v291_v50  ;;  %v969_v56 = vmul.u32.u64.high %v912_v26, %v291_v50, %v968_v55  ;;  %v973_v57 = vmul.u32.u64.low %v912_v26, %v295_v54  ;;  %v974_v58 = vmul.u32.u64.high %v912_v26, %v295_v54, %v973_v57 }
  0x33   :  { %v104_v60 = vshll.u32 %v964_v53, 30  ;;  %v455_v59 = vand.u32 2147483647, %v901_v8  ;;  %v470_v6 = vsub.s32 32, %v469_v61  ;;  %v472_v26 = vshll.u32 %v862_v28, %v469_v61 }
  0x34   :  { %v306_v0 = vadd.s32 1, %v969_v56  ;;  %vm305_vm12 = vc.u32 %v974_v58, %v968_v55  ;;  %v475_v15 = vshll.u32 %v863_v30, %v469_v61  ;;  %v478_v16 = vshll.u32 %v864_v32, %v469_v61 }
  0x35   :  { %v105_v63 = vsub.s32 %v101_v37, %v104_v60  ;;  %v462_v13 = vand.u32 8388607, %v455_v59  ;;  %v473_v18 = vshrl.u32 %v863_v30, %v470_v6  ;;  %v476_v19 = vshrl.u32 %v864_v32, %v470_v6 }
  0x36   :  { %v307_v5 = vsel %vm305_vm12, %v306_v0, %v969_v56  ;;  %v479_v20 = vshrl.u32 %v865_v34, %v470_v6  ;;  %v468_v22 = vshrl.u32 %v467_v52, 5  ;;  %v481_v23 = vshll.u32 %v865_v34, %v469_v61 }
  0x37   :  { %v107_v1 = vsub.s32 0, %v105_v63  ;;  %v308_v7 = vadd.s32 %v307_v5, %v303_v62  ;;  %v482_v24 = vshrl.u32 %v866_v36, %v470_v6  ;;  %v97_v25 = vadd.s32 %v937_v10, %v934_v9 }
  0x38   :  { %v463_v29 = vor.u32 8388608, %v462_v13  ;;  %v471_v30 = vshrl.u32 %v862_v28, %v470_v6  ;;  %v484_v32 = vshll.u32 %v866_v36, %v469_v61  ;;  %v485_v33 = vshrl.u32 %v867_v44, %v470_v6 }
  0x39   :  { %v787_v11 = vmin.u32 %v107_v1, %v105_v63  ;;  %v309_v14 = vadd.s32 536870912, %v308_v7  ;;  %v474_v35 = vor.u32 %v473_v18, %v472_v26  ;;  %v477_v37 = vor.u32 %v476_v19, %v475_v15 }
  0x3a   :  { %v480_v38 = vor.u32 %v479_v20, %v478_v16  ;;  %v483_v40 = vor.u32 %v482_v24, %v481_v23  ;;  %vm490_vm14 = vcmp.lt.s32.totalorder %v468_v22, 4  ;;  %v486_v43 = vor.u32 %v485_v33, %v484_v32 }
  0x3b   :  { %v109_v17 = vclz %v787_v11  ;;  %v991_v21 = vshrl.u32 %v309_v14, 30  ;;  %vm487_vm15 = vcmp.lt.s32.totalorder %v468_v22, 1  ;;  %vm489_vm0 = vcmp.lt.s32.totalorder %v468_v22, 3 }
  0x3c   :  { %v492_v42 = vsel %vm490_vm14, %v480_v38, 2102212464  ;;  %v503_v45 = vshll.u32 %v463_v29, 8  ;;  %vm488_vm1 = vcmp.lt.s32.totalorder %v468_v22, 2  ;;  %v491_v47 = vsel %vm487_vm15, %v471_v30, %v474_v35  ;;  %v37_v22 = vld [vmem:[%s1180_s0 + $0x7] sm:$0x1] }
  0x3d   :  { %v788_v27 = vadd.s32 4294967294, %v109_v17  ;;  %v311_v31 = vshll.u32 %v991_v21, 30  ;;  %v493_v48 = vsel %vm489_vm0, %v477_v37, %v492_v42  ;;  %v495_v51 = vsel %vm487_vm15, %v474_v35, %v477_v37  ;;  %v33_v17 = vld [vmem:[%s1180_s0 + $0x6] sm:$0x1] }
  0x3e   :  { %v496_v52 = vsel %vm490_vm14, %v483_v40, 920167782  ;;  %v499_v57 = vsel %vm487_vm15, %v477_v37, %v480_v38  ;;  %v500_v60 = vsel %vm490_vm14, %v486_v43, 1326507024  ;;  %vm43_vm2 = vcmp.lt.s32.totalorder %v892_v2, 0 }
  0x3f   :  { %vm789_vm13 = vcmp.lt.s32.totalorder %v788_v27, 0  ;;  %v1001_v39 = vsub.s32 %v308_v7, %v311_v31  ;;  %v497_v56 = vsel %vm489_vm0, %v480_v38, %v496_v52  ;;  %v494_v1 = vsel %vm488_vm1, %v491_v47, %v493_v48 }
  0x40   :  { %v112_v34 = vsel %vm789_vm13, 0, %v788_v27  ;;  %v498_v5 = vsel %vm488_vm1, %v495_v51, %v497_v56  ;;  %v501_v6 = vsel %vm489_vm0, %v483_v40, %v500_v60  ;;  %v304_v26 = vadd.s32 %v968_v55, %v974_v58 }
  0x41   :  { %v113_v9 = vsub.s32 32, %v112_v34  ;;  %v114_v10 = vshll.u32 %v105_v63, %v112_v34  ;;  %v117_v41 = vsub.s32 4294967266, %v112_v34  ;;  %v314_v28 = vsub.s32 0, %v1001_v39 }
  0x42   :  { %v127_v63 = vsub.s32 4, %v964_v53  ;;  %v502_v11 = vsel %vm488_vm1, %v499_v57, %v501_v6  ;;  %v1016_v13 = vmul.u32.u64.low %v503_v45, %v498_v5  ;;  %v1017_v14 = vmul.u32.u64.high %v503_v45, %v498_v5, %v1016_v13 }
  0x43   :  { %v115_v36 = vshrl.u32 %v97_v25, %v113_v9  ;;  %v118_v44 = vadd.s32 127, %v117_v41  ;;  %v795_v46 = vmin.u32 %v314_v28, %v1001_v39  ;;  %v510_v24 = vmul.u32 %v503_v45, %v494_v1 }
  0x44   :  { %v1022_v15 = vmul.u32.u64.low %v503_v45, %v502_v11  ;;  %v1023_v16 = vmul.u32.u64.high %v503_v45, %v502_v11, %v1022_v15  ;;  %v128_v19 = vsel %vm43_vm2, %v127_v63, %v964_v53  ;;  %v513_v27 = vadd.s32 1, %v1017_v14 }
  0x45   :  { %v116_v49 = vor.u32 %v115_v36, %v114_v10  ;;  %v119_v50 = vshll.u32 %v118_v44, 23  ;;  %v316_v54 = vclz %v795_v46  ;;  %v34_v29 = vmul.f32 0.01, %v33_v17 }
  0x46   :  { %vm512_vm5 = vc.u32 %v1023_v16, %v1016_v13  ;;  %v38_v53 = vmul.f32 0.01, %v37_v22  ;;  %v130_v33 = vsel %vm42_vm4, 0, %v128_v19  ;;  %v334_v42 = vsub.s32 4, %v991_v21 }
  0x47   :  { %v120_v61 = vor.u32 4788187, %v119_v50  ;;  %v123_v62 = vcvt.s32.f32 %v116_v49  ;;  %v796_v0 = vadd.s32 4294967294, %v316_v54  ;;  %v514_v35 = vsel %vm512_vm5, %v513_v27, %v1017_v14 }
  0x48   :  { %v515_v34 = vadd.s32 %v514_v35, %v510_v24  ;;  %v35_v10 = vmul.f32 1.442695, %v34_v29  ;;  %v237_v41 = vadd.s32 3, %v130_v33  ;;  %v39_v28 = vmul.f32 1.442695, %v38_v53 }
  0x49   :  { %v121_v7 = vand.u32 2147483647, %v120_v61  ;;  %vm797_vm3 = vcmp.lt.s32.totalorder %v796_v0, 0  ;;  %v134_v44 = vand.u32 3, %v130_v33  ;;  %vm250_vm6 = vcmp.lt.s32.totalorder %v894_v3, 0 }
  0x4a   :  { %v319_v20 = vsel %vm797_vm3, 0, %v796_v0  ;;  %v516_v9 = vadd.s32 536870912, %v515_v34  ;;  %v238_v47 = vand.u32 3, %v237_v41  ;;  %v335_v48 = vsel %vm250_vm6, %v334_v42, %v991_v21 }
  0x4b   :  { %v124_v18 = vmul.f32 %v123_v62, %v121_v7  ;;  %v320_v23 = vsub.s32 32, %v319_v20  ;;  %v321_v55 = vshll.u32 %v1001_v39, %v319_v20  ;;  %v324_v58 = vsub.s32 4294967266, %v319_v20 }
  0x4c   :  { %v1045_v36 = vshrl.u32 %v516_v9, 30  ;;  %vm249_vm7 = vcmp.le.f32.partialorder %v248_v12, 0.7853982  ;;  %vm135_vm8 = vcmp.lt.s32.totalorder %v134_v44, 2  ;;  %vm136_vm9 = vcmp.eq.s32.totalorder %v134_v44, 0 }
  0x4d   :  { %v125_v25 = vxor.u32 2147483648, %v124_v18  ;;  %v322_v31 = vshrl.u32 %v304_v26, %v320_v23  ;;  %v325_v30 = vadd.s32 127, %v324_v58  ;;  %v337_v52 = vsel %vm249_vm7, 0, %v335_v48 }
  0x4e   :  { %v518_v46 = vshll.u32 %v1045_v36, 30  ;;  %vm139_vm10 = vcmp.eq.s32.totalorder %v134_v44, 2  ;;  %vm243_vm11 = vcmp.eq.s32.totalorder %v238_v47, 2  ;;  %vm240_vm12 = vcmp.eq.s32.totalorder %v238_v47, 0 }
  0x4f   :  { %v126_v32 = vsel %vm43_vm2, %v125_v25, %v124_v18  ;;  %v323_v38 = vor.u32 %v322_v31, %v321_v55  ;;  %v326_v4 = vshll.u32 %v325_v30, 23  ;;  %vm239_vm13 = vcmp.lt.s32.totalorder %v238_v47, 2 }
  0x50   :  { %v129_v37 = vsel %vm42_vm4, %v892_v2, %v126_v32  ;;  %v1054_v50 = vsub.s32 %v515_v34, %v518_v46  ;;  %v444_v62 = vadd.s32 3, %v337_v52  ;;  %vm133_vm14 = vweird.f32 %v892_v2 }
  0x51   :  { %831 = vcosq.f32 %v129_v37  ;;  %v327_v39 = vor.u32 4788187, %v326_v4  ;;  %v330_v40 = vcvt.s32.f32 %v323_v38  ;;  %v341_v17 = vand.u32 3, %v337_v52 }
  0x52   :  { %833 = vsinq.f32 %v129_v37  ;;  %v521_v54 = vsub.s32 0, %v1054_v50  ;;  %v445_v18 = vand.u32 3, %v444_v62  ;;  %v511_v22 = vadd.s32 %v1016_v13, %v1023_v16 }
  0x53   :  { %v328_v43 = vand.u32 2147483647, %v327_v39  ;;  %835 = vpow2.f32 %v35_v10  ;;  %v1090_v24 = vstv %s666_s26  ;;  %v1094_v29 = vstv %s667_s27 }
  0x54   :  { %837 = vpow2.f32 %v39_v28  ;;  %v803_v12 = vmin.u32 %v521_v54, %v1054_v50  ;;  %vm342_vm0 = vcmp.lt.s32.totalorder %v341_v17, 2  ;;  %vm346_vm1 = vcmp.eq.s32.totalorder %v341_v17, 2  ;;  %v32_v28 = vld [vmem:[%s1180_s0 + $0x5] sm:$0x1] }
  0x55   :  { %v331_v45 = vmul.f32 %v330_v40, %v328_v43  ;;  %vm450_vm2 = vcmp.eq.s32.totalorder %v445_v18, 2  ;;  %vm343_vm3 = vcmp.eq.s32.totalorder %v341_v17, 0  ;;  %vm446_vm4 = vcmp.lt.s32.totalorder %v445_v18, 2 }
  0x56   :  { %v523_v1 = vclz %v803_v12  ;;  %vm447_vm5 = vcmp.eq.s32.totalorder %v445_v18, 0  ;;  %v685_v4 = vstv %s665_s28 }
  0x57   :  { %v332_v49 = vxor.u32 2147483648, %v331_v45 }
  0x58   :  { %v804_v14 = vadd.s32 4294967294, %v523_v1 }
  0x59   :  { %v333_v51 = vsel %vm250_vm6, %v332_v49, %v331_v45  ;;  %vm340_vm6 = vweird.f32 %v894_v3  ;;  %v675_v45 = vstv %s1056_s24  ;;  %v541_v49 = vsub.s32 4, %v1045_v36 }
  0x5a   :  { %v336_v21 = vsel %vm249_vm7, %v894_v3, %v333_v51  ;;  %vm805_vm15 = vcmp.lt.s32.totalorder %v804_v14, 0  ;;  %vm457_vm7 = vcmp.lt.s32.totalorder %v901_v8, 0 }
  0x5b   :  { %v832_v56 = vpop.eup %831  ;;  %839 = vcosq.f32 %v336_v21  ;;  %v526_v55 = vsel %vm805_vm15, 0, %v804_v14  ;;  %v542_v62 = vsel %vm457_vm7, %v541_v49, %v1045_v36  ;;  %vm770_vm15 = vcmask 1046528  }
  0x5c   :  { %v834_v57 = vpop.eup %833  ;;  %v140_v60 = vxor.u32 2147483648, %v832_v56  ;;  %841 = vsinq.f32 %v336_v21  ;;  %v527_v25 = vsub.s32 32, %v526_v55  ;;  %v528_v2 = vshll.u32 %v1054_v50, %v526_v55 }
  0x5d   :  { %v137_v61 = vxor.u32 2147483648, %v834_v57  ;;  %v1068_v26 = vpop.eup %835  ;;  %v531_v27 = vsub.s32 4294967266, %v526_v55  ;;  %v676_v21 = vadd.f32 %v675_v45, %v32_v28 }
  0x5e   :  { %v141_v63 = vsel %vm139_vm10, %v140_v60, %v834_v57  ;;  %v245_v0 = vsel %vm243_vm11, %v140_v60, %v834_v57  ;;  %v1074_v19 = vpop.eup %837  ;;  %v529_v30 = vshrl.u32 %v511_v22, %v527_v25  ;;  %v1110_v46 = vmul.f32 %v1068_v26, %v685_v4 }
  0x5f   :  { %v138_v5 = vsel %vm136_vm9, %v832_v56, %v137_v61  ;;  %v242_v6 = vsel %vm240_vm12, %v832_v56, %v137_v61  ;;  %v532_v53 = vadd.s32 127, %v531_v27  ;;  %vm456_vm9 = vcmp.le.f32.partialorder %v455_v59, 0.7853982 }
  0x60   :  { %v142_v7 = vsel %vm135_vm8, %v138_v5, %v141_v63  ;;  %v246_v11 = vsel %vm239_vm13, %v242_v6, %v245_v0  ;;  %v530_v37 = vor.u32 %v529_v30, %v528_v2  ;;  %vm758_vm8 = vcmask 1040384  }
  0x61   :  { %v1072_v15 = vsel %vm133_vm14, nan, %v246_v11  ;;  %v1078_v20 = vsel %vm133_vm14, nan, %v142_v7  ;;  %v533_v38 = vshll.u32 %v532_v53, 23  ;;  %vm760_vm10 = vcmask 1041408  }
  0x62   :  { %v1084_v23 = vmul.f32 %v1068_v26, %v1072_v15  ;;  %v1088_v58 = vmul.f32 %v1074_v19, %v1078_v20  ;;  %v537_v42 = vcvt.s32.f32 %v530_v37  ;;  %v544_v7 = vsel %vm456_vm9, 0, %v542_v62 }
  0x63   :  { %v534_v41 = vor.u32 4788187, %v533_v38  ;;  %vm762_vm11 = vcmask 1042432   ;;  %vm764_vm12 = vcmask 1043456   ;;  %v651_v59 = vadd.s32 3, %v544_v7 }
  0x64   :  { %v692_v13 = vmul.f32 %v1090_v24, %v1084_v23  ;;  %v693_v16 = vmul.f32 %v1094_v29, %v1088_v58  ;;  %vm766_vm13 = vcmask 1044480   ;;  %vm768_vm14 = vcmask 1045504  }
  0x65   :  { %v840_v31 = vpop.eup %839  ;;  %v535_v48 = vand.u32 2147483647, %v534_v41  ;;  %v668_v18 = vsub.f32 0.0, %v1072_v15  ;;  %v548_v25 = vand.u32 3, %v544_v7  ;;  %v652_v2 = vand.u32 3, %v651_v59 }
  0x66   :  { %v842_v32 = vpop.eup %841  ;;  %v347_v33 = vxor.u32 2147483648, %v840_v31  ;;  %v1101_v40 = vadd.f32 %v693_v16, %v692_v13  ;;  %v681_v16 = vmul.f32 %v1068_v26, %v1078_v20  ;;  %v30_v20 = vld [vmem:[%s1180_s0 + $0x3] sm:$0x1]  ;;  %v671_v38 = vstv %s1061_s25 }
  0x67   :  { %v344_v35 = vxor.u32 2147483648, %v842_v32  ;;  %v538_v56 = vmul.f32 %v537_v42, %v535_v48  ;;  %v672_v42 = vadd.f32 %v671_v38, %v30_v20 }
  0x68   :  { %v348_v34 = vsel %vm346_vm1, %v347_v33, %v842_v32  ;;  %v452_v39 = vsel %vm450_vm2, %v347_v33, %v842_v32  ;;  %vm657_vm1 = vcmp.eq.s32.totalorder %v652_v2, 2  ;;  %vm549_vm2 = vcmp.lt.s32.totalorder %v548_v25, 2 }
  0x69   :  { %v345_v9 = vsel %vm343_vm3, %v840_v31, %v344_v35  ;;  %v449_v10 = vsel %vm447_vm5, %v840_v31, %v344_v35  ;;  %v539_v61 = vxor.u32 2147483648, %v538_v56  ;;  %v682_v31 = vmul.f32 %v1074_v19, %v668_v18 }
  0x6a   :  { %v349_v43 = vsel %vm342_vm0, %v345_v9, %v348_v34  ;;  %v453_v44 = vsel %vm446_vm4, %v449_v10, %v452_v39  ;;  %vm553_vm0 = vcmp.eq.s32.totalorder %v548_v25, 2  ;;  %vm550_vm3 = vcmp.eq.s32.totalorder %v548_v25, 0 }
  0x6b   :  { %v1112_v3 = vsel %vm340_vm6, nan, %v349_v43  ;;  %v1114_v47 = vsel %vm340_vm6, nan, %v453_v44  ;;  %v540_v5 = vsel %vm457_vm7, %v539_v61, %v538_v56  ;;  %vm654_vm4 = vcmp.eq.s32.totalorder %v652_v2, 0  ;;  %v31_v56 = vld [vmem:[%s1180_s0 + $0x4] sm:$0x1] }
  0x6c   :  { %v669_v50 = vsub.f32 0.0, %v1114_v47  ;;  %v722_v51 = vmul.f32 %v1084_v23, %v1112_v3  ;;  %v723_v52 = vmul.f32 %v1088_v58, %v1112_v3  ;;  %v725_v54 = vmul.f32 %v1101_v40, %v1112_v3 }
  0x6d   :  { %v543_v6 = vsel %vm456_vm9, %v901_v8, %v540_v5  ;;  %vm653_vm5 = vcmp.lt.s32.totalorder %v652_v2, 2  ;;  %v688_v33 = vmul.f32 %v1090_v24, %v681_v16  ;;  %v690_v19 = vmul.f32 %v1094_v29, %v682_v31 }
  0x6e   :  { %v721_v57 = vmul.f32 %v1068_v26, %v669_v50  ;;  %v724_v60 = vmul.f32 %v1110_v46, %v669_v50  ;;  %v750_v12 = vrot.slane %v722_v51, 7  ;;  %v753_v63 = vrot.slane %v723_v52, 6 }
  0x6f   :  { %843 = vcosq.f32 %v543_v6  ;;  %vm547_vm6 = vweird.f32 %v901_v8  ;;  %v691_v24 = vadd.f32 %v690_v19, %v688_v33  ;;  %v673_v43 = vstv %s1050_s23 }
  0x70   :  { %v726_v0 = vadd.f32 %v725_v54, %v724_v60  ;;  %v772_v1 = vsel %vm758_vm8, %v721_v57, %v750_v12  ;;  %845 = vsinq.f32 %v543_v6  ;;  %v674_v6 = vadd.f32 %v673_v43, %v31_v56 }
  0x71   :  { %v773_v14 = vsel %vm760_vm10, %v772_v1, %v753_v63 }
  0x72   :  { %v727_v11 = vadd.f32 %v726_v0, %v676_v21 }
  0x74   :  { %v756_v17 = vrot.slane %v727_v11, 5 }
  0x76   :  { %v774_v36 = vsel %vm762_vm11, %v773_v14, %v756_v17 }
  0x77   :  { %v775_v22 = vsel %vm764_vm12, %v774_v36, 0.0 }
  0x78   :  { %v776_v55 = vsel %vm766_vm13, %v775_v22, 0.0 }
  0x79   :  { %v777_v27 = vsel %vm768_vm14, %v776_v55, 0.0  ;;  %v844_v15 = vpop.eup %843 }
  0x7a   :  { %v778_v13 = vsel %vm770_vm15, %v777_v27, 1.0  ;;  %v846_v30 = vpop.eup %845  ;;  %v554_v53 = vxor.u32 2147483648, %v844_v15 }
  0x7b   :  { %780 = vst [vmem:[%s1182_s2 + $0x8] sm:$0xff] %v778_v13  ;;  %v551_v32 = vxor.u32 2147483648, %v846_v30 }
  0x7c   :  { %v555_v35 = vsel %vm553_vm0, %v554_v53, %v846_v30  ;;  %v659_v37 = vsel %vm657_vm1, %v554_v53, %v846_v30 }
  0x7d   :  { %v552_v4 = vsel %vm550_vm3, %v844_v15, %v551_v32  ;;  %v656_v34 = vsel %vm654_vm4, %v844_v15, %v551_v32 }
  0x7e   :  { %v556_v39 = vsel %vm549_vm2, %v552_v4, %v555_v35  ;;  %v660_v9 = vsel %vm653_vm5, %v656_v34, %v659_v37 }
  0x7f   :  { %v557_v10 = vsel %vm547_vm6, nan, %v556_v39  ;;  %v661_v41 = vsel %vm547_vm6, nan, %v660_v9 }
  0x80   :  { %v670_v28 = vsub.f32 0.0, %v661_v41  ;;  %v677_v29 = vmul.f32 %v557_v10, %v1112_v3  ;;  %v678_v44 = vmul.f32 %v557_v10, %v1114_v47  ;;  %v679_v45 = vmul.f32 %v661_v41, %v1112_v3 }
  0x81   :  { %v680_v8 = vmul.f32 %v661_v41, %v1114_v47  ;;  %v709_v48 = vmul.f32 %v681_v16, %v557_v10  ;;  %v712_v49 = vmul.f32 %v682_v31, %v557_v10  ;;  %v716_v54 = vmul.f32 %v691_v24, %v557_v10 }
  0x82   :  { %v696_v50 = vmul.f32 %v681_v16, %v670_v28  ;;  %v697_v51 = vmul.f32 %v1084_v23, %v678_v44  ;;  %v699_v52 = vmul.f32 %v682_v31, %v670_v28  ;;  %v700_v21 = vmul.f32 %v1088_v58, %v678_v44 }
  0x83   :  { %v702_v57 = vmul.f32 %v1110_v46, %v677_v29  ;;  %v703_v60 = vmul.f32 %v691_v24, %v670_v28  ;;  %v705_v3 = vmul.f32 %v1101_v40, %v678_v44  ;;  %v695_v47 = vmul.f32 %v1068_v26, %v677_v29 }
  0x84   :  { %v698_v12 = vadd.f32 %v697_v51, %v696_v50  ;;  %v710_v61 = vmul.f32 %v1084_v23, %v680_v8  ;;  %v713_v62 = vmul.f32 %v1088_v58, %v680_v8  ;;  %v701_v63 = vadd.f32 %v700_v21, %v699_v52 }
  0x85   :  { %v704_v0 = vadd.f32 %v703_v60, %v702_v57  ;;  %v715_v1 = vmul.f32 %v1110_v46, %v679_v45  ;;  %v718_v5 = vmul.f32 %v1101_v40, %v680_v8  ;;  %v708_v7 = vmul.f32 %v1068_v26, %v679_v45 }
  0x86   :  { %v729_v11 = vrot.slane %v698_v12, 7  ;;  %v711_v17 = vadd.f32 %v710_v61, %v709_v48  ;;  %v732_v36 = vrot.slane %v701_v63, 6  ;;  %v714_v18 = vadd.f32 %v713_v62, %v712_v49 }
  0x87   :  { %v706_v14 = vadd.f32 %v705_v3, %v704_v0  ;;  %v717_v59 = vadd.f32 %v716_v54, %v715_v1  ;;  %v738_v58 = vrot.slane %v708_v7, 4 }
  0x88   :  { %v759_v22 = vsel %vm758_vm8, %v695_v47, %v729_v11  ;;  %v741_v27 = vrot.slane %v711_v17, 3  ;;  %v744_v40 = vrot.slane %v714_v18, 2 }
  0x89   :  { %v707_v23 = vadd.f32 %v706_v14, %v672_v42  ;;  %v719_v55 = vadd.f32 %v718_v5, %v717_v59  ;;  %v761_v25 = vsel %vm760_vm10, %v759_v22, %v732_v36 }
  0x8b   :  { %v720_v2 = vadd.f32 %v719_v55, %v674_v6  ;;  %v735_v46 = vrot.slane %v707_v23, 5 }
  0x8d   :  { %v747_v13 = vrot.slane %v720_v2, 1  ;;  %v763_v26 = vsel %vm762_vm11, %v761_v25, %v735_v46 }
  0x8e   :  { %v765_v16 = vsel %vm764_vm12, %v763_v26, %v738_v58 }
  0x8f   :  { %v767_v31 = vsel %vm766_vm13, %v765_v16, %v741_v27 }
  0x90   :  { %v769_v15 = vsel %vm768_vm14, %v767_v31, %v744_v40 }
  0x91   :  { %v771_v30 = vsel %vm770_vm15, %v769_v15, %v747_v13 }
  0x92   :  { %779 = vst [vmem:[%s1182_s2] sm:$0xff] %v771_v30 }
  0x93   :  { %785 = vsyncpa [#allocation3], 1 }

</bundles_post_ra>
